<compile_context>
chip_gen: v6e
topology: v6e:2x2x1
jax: 0.10.0
libtpu: 0.0.40
codegen_flags: <defaults>
</compile_context>

<pallas_src>
import functools

import jax
import jax.numpy as jnp
import numpy as np
from jax.experimental import pallas as pl
from jax.experimental.pallas import tpu as pltpu


def _bevformer_kernel(heads, head_dim, mm_dtype, approx_recip,
                      prev_ref, query_ref, img_ref,
                      wqt_ref, wkvsum_t_ref, wqs_ref, wkvsum_s_ref,
                      rep2_ref, w1_ref, w2_ref, vecs_ref, out_ref):
    f32 = jnp.float32
    E = wqt_ref.shape[0]

    prev = prev_ref[...]        # (T, E)  f32
    query = query_ref[...]      # (T, E)  f32
    img = img_ref[...]          # (T, E)  f32

    vecs = vecs_ref[...]        # (8, 2E) packed small vectors
    b1 = vecs[0:1]                               # (1, 2E)
    b2 = vecs[1:2, :E]
    g1, be1 = vecs[2:3, :E], vecs[3:4, :E]
    g2, be2 = vecs[4:5, :E], vecs[5:6, :E]
    g3, be3 = vecs[6:7, :E], vecs[7:8, :E]

    rep2 = rep2_ref[...]        # (2*hd, 2E) exact 0/1 replication matrix (f32)

    def mm(a, b):
        # MXU matmul; operands in mm_dtype (bf16 on the fast path), f32 accum.
        return jnp.dot(a.astype(mm_dtype), b.astype(mm_dtype),
                       preferred_element_type=f32)

    def layernorm(x, g, b):
        mu = jnp.mean(x, axis=-1, keepdims=True)
        var = jnp.mean((x - mu) ** 2, axis=-1, keepdims=True)
        return (x - mu) * jax.lax.rsqrt(var + 1e-5) * g + b

    # Per-head lane-group masks, (1, E) only — they broadcast against (T, E).
    col = jax.lax.broadcasted_iota(jnp.int32, (1, E), 1)
    head_masks = [jnp.logical_and(col >= h * head_dim, col < (h + 1) * head_dim)
                  for h in range(heads)]
    neg = jnp.float32(jnp.finfo(jnp.float32).min)

    def group_softmax(a):
        # Softmax over each head's head_dim-wide lane group.  Per-group max
        # shift (stable even if one head sits far below the row max) and exact
        # f32 segmented sums on the VPU/XLU.
        gmax = jnp.zeros_like(a)
        for m in head_masks:
            hmax = jnp.max(jnp.where(m, a, neg), axis=-1, keepdims=True)
            gmax = jnp.where(m, hmax, gmax)
        e = jnp.exp(a - gmax)
        gsum = jnp.zeros_like(e)
        for m in head_masks:
            hsum = jnp.sum(jnp.where(m, e, 0.0), axis=-1, keepdims=True)
            gsum = jnp.where(m, hsum, gsum)
        if approx_recip:
            # EUP slot — essentially free next to the MXU/VPU work.
            return e * pl.reciprocal(gsum, approx=True)
        return e / gsum            # gsum >= 1 always -> never NaN

    inv_sqrt_e = 1.0 / jnp.sqrt(jnp.float32(E))
    inv_sqrt_hd = 1.0 / jnp.sqrt(jnp.float32(head_dim))

    def attention(x_q, x_kv, wq_ref, wkvsum_ref, extra_scale):
        q = mm(x_q, wq_ref[...])                       # (T, E)
        # Folded projection: columns are already summed over heads -> (T, 2hd)
        # holding [K-sum | V-sum] per position-within-head.
        kv_sum = mm(x_kv, wkvsum_ref[...])             # (T, 2*hd)
        # Exact 0/1 replication back across heads (always f32; tiny MXU cost).
        kv_rep = jnp.dot(kv_sum, rep2, preferred_element_type=f32)   # (T, 2E)
        attn = q * kv_rep[:, :E] * extra_scale         # einsum('nqd,nkd->nqd')
        sm = group_softmax(attn * inv_sqrt_e)
        return sm * kv_rep[:, E:]                      # einsum('nsd,nvd->nsd')

    # ---- temporal self attention -------------------------------------------
    out_t = attention(query, prev, wqt_ref, wkvsum_t_ref, 1.0)
    x = layernorm(out_t + query, g1, be1)

    # ---- spatial cross attention (extra 1/sqrt(head_dim) scale) -------------
    out_s = attention(x, img, wqs_ref, wkvsum_s_ref, inv_sqrt_hd)
    x = layernorm(out_s + x, g2, be2)

    # ---- feed forward --------------------------------------------------------
    h1 = jnp.maximum(mm(x, w1_ref[...]) + b1, 0.0)
    ff = mm(h1, w2_ref[...]) + b2

    out = layernorm(ff + x, g3, be3)

    # Per-tile row sum; the wrapper finishes the mean over all N rows
    # (== out.transpose(1, 0).mean(dim=-1) in the PyTorch module).
    out_ref[...] = jnp.sum(out, axis=0, keepdims=True)


def bevformer_forward(prev_seq, query, img_ft, params, heads,
                      matmul_dtype=jnp.float32, tile_n=None,
                      vmem_limit_bytes=None):
    N, E = query.shape
    hd = E // heads
    f32 = jnp.float32
    p = params
    mm_dtype = jnp.dtype(matmul_dtype)
    fast = mm_dtype != jnp.dtype(jnp.float32)

    # ---- hoisted constants (built once in the wrapper, stay VMEM-resident) --
    # Fold the over-heads sum into the K/V projection weights: K and V only
    # ever appear through their per-position head sums (see kernel docstring).
    def fold(w):                                  # (E, E) -> (E, hd)
        return w.reshape(E, heads, hd).sum(axis=1)

    wkv_sum_t = jnp.concatenate([fold(p["wkt"]), fold(p["wvt"])], axis=1)  # (E, 2hd)
    wkv_sum_s = jnp.concatenate([fold(p["wks"]), fold(p["wvs"])], axis=1)  # (E, 2hd)

    # Exact 0/1 replication matrix (2hd, 2E): tiles [K-sum | V-sum] back across
    # heads; every output element is a single 1*x product (no rounding).
    rep_np = np.zeros((2 * hd, 2 * E), np.float32)
    eye = np.eye(hd, dtype=np.float32)
    for h in range(heads):
        rep_np[:hd, h * hd:(h + 1) * hd] = eye
        rep_np[hd:, E + h * hd:E + (h + 1) * hd] = eye
    rep2 = jnp.asarray(rep_np)

    # Pack the nine small bias / layernorm vectors into one (8, 2E) block.
    def pad(v):
        return jnp.concatenate([v, jnp.zeros((E,), f32)])
    vecs = jnp.stack([p["b1"],
                      pad(p["b2"]),
                      pad(p["g1"]), pad(p["be1"]),
                      pad(p["g2"]), pad(p["be2"]),
                      pad(p["g3"]), pad(p["be3"])], axis=0)               # (8, 2E)

    # Pre-cast matmul weights (halves their VMEM/HBM footprint on the bf16
    # path); rep2/vecs stay f32 (exact replication, f32 LN/bias math).
    cast = lambda a: a.astype(mm_dtype)
    wqt, wqs = cast(p["wqt"]), cast(p["wqs"])
    wkv_sum_t, wkv_sum_s = cast(wkv_sum_t), cast(wkv_sum_s)
    w1, w2 = cast(p["w1"]), cast(p["w2"])

    # ---- row tiling ----------------------------------------------------------
    if tile_n is None:
        tile_n = min(N, 512 if fast else 256)
    tile_n = max(1, min(tile_n, N))
    while N % tile_n:            # TODO(synk): pad + mask ragged N instead
        tile_n -= 1
    num_tiles = N // tile_n

    # ---- VMEM budget heuristic (only raise the limit when actually needed) ---
    if vmem_limit_bytes is None:
        const_bytes = 2 * sum(int(a.size) * a.dtype.itemsize
                              for a in (wqt, wkv_sum_t, wqs, wkv_sum_s,
                                        rep2, w1, w2, vecs))
        row_bytes = 2 * 3 * tile_n * E * prev_seq.dtype.itemsize   # dbl-buffered
        live_bytes = 12 * tile_n * 2 * E * 4                       # f32 temporaries
        est = const_bytes + row_bytes + live_bytes
        if est > (12 << 20):
            # cap at 64 MiB so the request is valid on v7x's smaller VMEM too
            vmem_limit_bytes = int(min(64 << 20, 2 * est))

    row_spec = pl.BlockSpec((tile_n, E), lambda i: (i, 0))

    def const_spec(a):
        # Constant block index -> fetched once, VMEM-resident across the grid.
        return pl.BlockSpec(a.shape, lambda i: (0, 0))

    inputs = [prev_seq, query, img_ft,
              wqt, wkv_sum_t, wqs, wkv_sum_s,
              rep2, w1, w2, vecs]
    in_specs = [row_spec, row_spec, row_spec] + [const_spec(a) for a in inputs[3:]]

    partial_sums = pl.pallas_call(
        functools.partial(_bevformer_kernel, heads, hd, mm_dtype, fast),
        out_shape=jax.ShapeDtypeStruct((num_tiles, E), jnp.float32),
        grid=(num_tiles,),
        in_specs=in_specs,
        out_specs=pl.BlockSpec((1, E), lambda i: (i, 0)),
        compiler_params=pltpu.CompilerParams(
            dimension_semantics=("parallel",),
            vmem_limit_bytes=vmem_limit_bytes),
    )(*inputs)

    # Finish the row-mean across tiles (tiny XLA op; keeps the grid axis fully
    # parallel so both v7x TensorCores get independent work).
    return jnp.sum(partial_sums, axis=0) / jnp.float32(N)


# ---------------- pure-JAX reference (mirrors the PyTorch code) ----------------
def _ref_forward(prev_seq, query, img_ft, p, heads):
    N, E = query.shape
    hd = E // heads

    def layernorm(x, g, b):
        mu = jnp.mean(x, axis=-1, keepdims=True)
        var = jnp.mean((x - mu) ** 2, axis=-1, keepdims=True)
        return (x - mu) * jax.lax.rsqrt(var + 1e-5) * g + b

    def odd_attention(value, key, q_in, wv, wk, wq, div_by_scale):
        v = (value @ wv).reshape(N, heads, hd)
        k = (key @ wk).reshape(N, heads, hd)
        q = (q_in @ wq).reshape(N, heads, hd)
        a = jnp.einsum("nqd,nkd->nqd", q, k)
        if div_by_scale:
            a = a / jnp.sqrt(jnp.float32(hd))
        a = jax.nn.softmax(a / jnp.sqrt(jnp.float32(E)), axis=-1)
        return jnp.einsum("nsd,nvd->nsd", a, v).reshape(N, E)

    attention = odd_attention(prev_seq, prev_seq, query,
                              p["wvt"], p["wkt"], p["wqt"], False)
    x = layernorm(attention + query, p["g1"], p["be1"])
    cross = odd_attention(img_ft, img_ft, x,
                          p["wvs"], p["wks"], p["wqs"], True)
    x = layernorm(cross + x, p["g2"], p["be2"])
    h = jnp.maximum(x @ p["w1"] + p["b1"], 0.0)
    ff = h @ p["w2"] + p["b2"]
    out = layernorm(ff + x, p["g3"], p["be3"])
    return jnp.mean(out.T, axis=-1)


if __name__ == "__main__":
    N, E, heads, seqL = 8, 32, 4, 5  # seqL unused by the forward pass

    key = jax.random.PRNGKey(0)
    ks = jax.random.split(key, 16)

    def rnd(k, shape, scale=0.1):
        return (scale * jax.random.normal(k, shape)).astype(jnp.float32)

    params = {
        # attention linears (stored as in_features x out_features)
        "wqt": rnd(ks[0], (E, E)), "wkt": rnd(ks[1], (E, E)), "wvt": rnd(ks[2], (E, E)),
        "wqs": rnd(ks[3], (E, E)), "wks": rnd(ks[4], (E, E)), "wvs": rnd(ks[5], (E, E)),
        # feed-forward
        "w1": rnd(ks[6], (E, 2 * E)), "b1": rnd(ks[7], (2 * E,)),
        "w2": rnd(ks[8], (2 * E, E)), "b2": rnd(ks[9], (E,)),
        # layer norms (PyTorch defaults: gamma=1, beta=0)
        "g1": jnp.ones((E,), jnp.float32), "be1": jnp.zeros((E,), jnp.float32),
        "g2": jnp.ones((E,), jnp.float32), "be2": jnp.zeros((E,), jnp.float32),
        "g3": jnp.ones((E,), jnp.float32), "be3": jnp.zeros((E,), jnp.float32),
    }

    prev_seq = rnd(ks[10], (N, E), 1.0)
    query = rnd(ks[11], (N, E), 1.0)
    img_ft = rnd(ks[12], (N, E), 1.0)

    ref = _ref_forward(prev_seq, query, img_ft, params, heads)
    ref = jax.block_until_ready(ref)

    # Exact (f32 matmul) path — tight comparison against the reference.
    out = bevformer_forward(prev_seq, query, img_ft, params, heads)
    out = jax.block_until_ready(out)
    np.testing.assert_allclose(np.asarray(out), np.asarray(ref),
                               rtol=1e-4, atol=2e-5)

    # Fast (bf16-operand) path — the production setting for v6e/v7x; looser
    # tolerance since matmul operands are rounded to bf16.
    out_bf16 = bevformer_forward(prev_seq, query, img_ft, params, heads,
                                 matmul_dtype=jnp.bfloat16)
    out_bf16 = jax.block_until_ready(out_bf16)
    np.testing.assert_allclose(np.asarray(out_bf16), np.asarray(ref),
                               rtol=5e-2, atol=5e-2)

    print("KERNEL_OK")
</pallas_src>

<mosaic_0001>
module attributes {stable_mosaic.version = 11 : i64} {
  func.func @_bevformer_kernel(%arg0: i32, %arg1: memref<8x32xf32, #tpu.memory_space<vmem>>, %arg2: memref<8x32xf32, #tpu.memory_space<vmem>>, %arg3: memref<8x32xf32, #tpu.memory_space<vmem>>, %arg4: memref<32x32xf32, #tpu.memory_space<vmem>>, %arg5: memref<32x16xf32, #tpu.memory_space<vmem>>, %arg6: memref<32x32xf32, #tpu.memory_space<vmem>>, %arg7: memref<32x16xf32, #tpu.memory_space<vmem>>, %arg8: memref<16x64xf32, #tpu.memory_space<vmem>>, %arg9: memref<32x64xf32, #tpu.memory_space<vmem>>, %arg10: memref<64x32xf32, #tpu.memory_space<vmem>>, %arg11: memref<8x64xf32, #tpu.memory_space<vmem>>, %arg12: memref<1x32xf32, #tpu.memory_space<vmem>>) attributes {dimension_semantics = [#tpu.dimension_semantics<parallel>], iteration_bounds = array<i64: 1>, scalar_prefetch = 0 : i64, scratch_operands = 0 : i64, tpu.core_type = #tpu.core_type<tc>, window_params = [{transform_indices = @transform_0, window_bounds = array<i64: 8, 32>}, {transform_indices = @transform_1, window_bounds = array<i64: 8, 32>}, {transform_indices = @transform_2, window_bounds = array<i64: 8, 32>}, {pipeline_mode = #tpu.pipeline_mode<synchronous>, transform_indices = @transform_3, window_bounds = array<i64: 32, 32>}, {pipeline_mode = #tpu.pipeline_mode<synchronous>, transform_indices = @transform_4, window_bounds = array<i64: 32, 16>}, {pipeline_mode = #tpu.pipeline_mode<synchronous>, transform_indices = @transform_5, window_bounds = array<i64: 32, 32>}, {pipeline_mode = #tpu.pipeline_mode<synchronous>, transform_indices = @transform_6, window_bounds = array<i64: 32, 16>}, {pipeline_mode = #tpu.pipeline_mode<synchronous>, transform_indices = @transform_7, window_bounds = array<i64: 16, 64>}, {pipeline_mode = #tpu.pipeline_mode<synchronous>, transform_indices = @transform_8, window_bounds = array<i64: 32, 64>}, {pipeline_mode = #tpu.pipeline_mode<synchronous>, transform_indices = @transform_9, window_bounds = array<i64: 64, 32>}, {pipeline_mode = #tpu.pipeline_mode<synchronous>, transform_indices = @transform_10, window_bounds = array<i64: 8, 64>}, {transform_indices = @transform_11, window_bounds = array<i64: 1, 32>}]} {
    %c0 = arith.constant 0 : index
    %c0_0 = arith.constant 0 : index
    %0 = vector.load %arg1[%c0, %c0_0] : memref<8x32xf32, #tpu.memory_space<vmem>>, vector<8x32xf32>
    %c0_1 = arith.constant 0 : index
    %c0_2 = arith.constant 0 : index
    %1 = vector.load %arg2[%c0_1, %c0_2] : memref<8x32xf32, #tpu.memory_space<vmem>>, vector<8x32xf32>
    %c0_3 = arith.constant 0 : index
    %c0_4 = arith.constant 0 : index
    %2 = vector.load %arg3[%c0_3, %c0_4] : memref<8x32xf32, #tpu.memory_space<vmem>>, vector<8x32xf32>
    %c0_5 = arith.constant 0 : index
    %c0_6 = arith.constant 0 : index
    %3 = vector.load %arg11[%c0_5, %c0_6] : memref<8x64xf32, #tpu.memory_space<vmem>>, vector<8x64xf32>
    %4 = vector.extract_strided_slice %3 {offsets = [0, 0], sizes = [1, 64], strides = [1, 1]} : vector<8x64xf32> to vector<1x64xf32>
    %5 = vector.extract_strided_slice %3 {offsets = [1, 0], sizes = [1, 32], strides = [1, 1]} : vector<8x64xf32> to vector<1x32xf32>
    %6 = vector.extract_strided_slice %3 {offsets = [2, 0], sizes = [1, 32], strides = [1, 1]} : vector<8x64xf32> to vector<1x32xf32>
    %7 = vector.extract_strided_slice %3 {offsets = [3, 0], sizes = [1, 32], strides = [1, 1]} : vector<8x64xf32> to vector<1x32xf32>
    %8 = vector.extract_strided_slice %3 {offsets = [4, 0], sizes = [1, 32], strides = [1, 1]} : vector<8x64xf32> to vector<1x32xf32>
    %9 = vector.extract_strided_slice %3 {offsets = [5, 0], sizes = [1, 32], strides = [1, 1]} : vector<8x64xf32> to vector<1x32xf32>
    %10 = vector.extract_strided_slice %3 {offsets = [6, 0], sizes = [1, 32], strides = [1, 1]} : vector<8x64xf32> to vector<1x32xf32>
    %11 = vector.extract_strided_slice %3 {offsets = [7, 0], sizes = [1, 32], strides = [1, 1]} : vector<8x64xf32> to vector<1x32xf32>
    %c0_7 = arith.constant 0 : index
    %c0_8 = arith.constant 0 : index
    %12 = vector.load %arg8[%c0_7, %c0_8] : memref<16x64xf32, #tpu.memory_space<vmem>>, vector<16x64xf32>
    %13 = tpu.iota {dimensions = array<i32: 1>} : vector<1x32xi32>
    %c0_i32 = arith.constant 0 : i32
    %14 = vector.broadcast %c0_i32 : i32 to vector<1x32xi32>
    %15 = arith.cmpi sge, %13, %14 : vector<1x32xi32>
    %c8_i32 = arith.constant 8 : i32
    %16 = vector.broadcast %c8_i32 : i32 to vector<1x32xi32>
    %17 = arith.cmpi slt, %13, %16 : vector<1x32xi32>
    %18 = arith.andi %15, %17 : vector<1x32xi1>
    %c8_i32_9 = arith.constant 8 : i32
    %19 = vector.broadcast %c8_i32_9 : i32 to vector<1x32xi32>
    %20 = arith.cmpi sge, %13, %19 : vector<1x32xi32>
    %c16_i32 = arith.constant 16 : i32
    %21 = vector.broadcast %c16_i32 : i32 to vector<1x32xi32>
    %22 = arith.cmpi slt, %13, %21 : vector<1x32xi32>
    %23 = arith.andi %20, %22 : vector<1x32xi1>
    %c16_i32_10 = arith.constant 16 : i32
    %24 = vector.broadcast %c16_i32_10 : i32 to vector<1x32xi32>
    %25 = arith.cmpi sge, %13, %24 : vector<1x32xi32>
    %c24_i32 = arith.constant 24 : i32
    %26 = vector.broadcast %c24_i32 : i32 to vector<1x32xi32>
    %27 = arith.cmpi slt, %13, %26 : vector<1x32xi32>
    %28 = arith.andi %25, %27 : vector<1x32xi1>
    %c24_i32_11 = arith.constant 24 : i32
    %29 = vector.broadcast %c24_i32_11 : i32 to vector<1x32xi32>
    %30 = arith.cmpi sge, %13, %29 : vector<1x32xi32>
    %c32_i32 = arith.constant 32 : i32
    %31 = vector.broadcast %c32_i32 : i32 to vector<1x32xi32>
    %32 = arith.cmpi slt, %13, %31 : vector<1x32xi32>
    %33 = arith.andi %30, %32 : vector<1x32xi1>
    %cst = arith.constant 3.200000e+01 : f32
    %34 = math.sqrt %cst : f32
    %cst_12 = arith.constant 1.000000e+00 : f32
    %35 = arith.divf %cst_12, %34 : f32
    %cst_13 = arith.constant 8.000000e+00 : f32
    %36 = math.sqrt %cst_13 : f32
    %cst_14 = arith.constant 1.000000e+00 : f32
    %37 = arith.divf %cst_14, %36 : f32
    %c0_15 = arith.constant 0 : index
    %c0_16 = arith.constant 0 : index
    %38 = vector.load %arg4[%c0_15, %c0_16] : memref<32x32xf32, #tpu.memory_space<vmem>>, vector<32x32xf32>
    %cst_17 = arith.constant dense<0.000000e+00> : vector<8x32xf32>
    %39 = tpu.matmul %1, %38, %cst_17 {dimension_numbers = #tpu.dot_dimension_numbers<[1], [0], [0], [1], [0, 0, 1, 1], [], []>} : vector<8x32xf32>, vector<32x32xf32>, vector<8x32xf32> -> vector<8x32xf32>
    %c0_18 = arith.constant 0 : index
    %c0_19 = arith.constant 0 : index
    %40 = vector.load %arg5[%c0_18, %c0_19] : memref<32x16xf32, #tpu.memory_space<vmem>>, vector<32x16xf32>
    %cst_20 = arith.constant dense<0.000000e+00> : vector<8x16xf32>
    %41 = tpu.matmul %0, %40, %cst_20 {dimension_numbers = #tpu.dot_dimension_numbers<[1], [0], [0], [1], [0, 0, 1, 1], [], []>} : vector<8x32xf32>, vector<32x16xf32>, vector<8x16xf32> -> vector<8x16xf32>
    %cst_21 = arith.constant dense<0.000000e+00> : vector<8x64xf32>
    %42 = tpu.matmul %41, %12, %cst_21 {dimension_numbers = #tpu.dot_dimension_numbers<[1], [0], [0], [1], [0, 0, 1, 1], [], []>} : vector<8x16xf32>, vector<16x64xf32>, vector<8x64xf32> -> vector<8x64xf32>
    %43 = vector.extract_strided_slice %42 {offsets = [0, 0], sizes = [8, 32], strides = [1, 1]} : vector<8x64xf32> to vector<8x32xf32>
    %44 = arith.mulf %39, %43 : vector<8x32xf32>
    %cst_22 = arith.constant 1.000000e+00 : f32
    %45 = vector.broadcast %cst_22 : f32 to vector<8x32xf32>
    %46 = arith.mulf %44, %45 : vector<8x32xf32>
    %47 = vector.broadcast %35 : f32 to vector<8x32xf32>
    %48 = arith.mulf %46, %47 : vector<8x32xf32>
    %cst_23 = arith.constant 0.000000e+00 : f32
    %49 = vector.broadcast %cst_23 : f32 to vector<8x32xf32>
    %cst_24 = arith.constant -3.40282347E+38 : f32
    %50 = vector.shape_cast %18 : vector<1x32xi1> to vector<1x32xi1>
    %51 = vector.broadcast %50 : vector<1x32xi1> to vector<8x32xi1>
    %52 = vector.broadcast %cst_24 : f32 to vector<8x32xf32>
    %53 = arith.select %51, %48, %52 : vector<8x32xi1>, vector<8x32xf32>
    %cst_25 = arith.constant dense<0xFF800000> : vector<8xf32>
    %54 = vector.multi_reduction <maximumf>, %53, %cst_25 [1] : vector<8x32xf32> to vector<8xf32>
    %55 = vector.shape_cast %54 : vector<8xf32> to vector<8x1xf32>
    %56 = vector.shape_cast %18 : vector<1x32xi1> to vector<1x32xi1>
    %57 = vector.broadcast %56 : vector<1x32xi1> to vector<8x32xi1>
    %58 = vector.shape_cast %55 : vector<8x1xf32> to vector<8x1xf32>
    %59 = vector.broadcast %58 : vector<8x1xf32> to vector<8x32xf32>
    %60 = arith.select %57, %59, %49 : vector<8x32xi1>, vector<8x32xf32>
    %cst_26 = arith.constant -3.40282347E+38 : f32
    %61 = vector.shape_cast %23 : vector<1x32xi1> to vector<1x32xi1>
    %62 = vector.broadcast %61 : vector<1x32xi1> to vector<8x32xi1>
    %63 = vector.broadcast %cst_26 : f32 to vector<8x32xf32>
    %64 = arith.select %62, %48, %63 : vector<8x32xi1>, vector<8x32xf32>
    %cst_27 = arith.constant dense<0xFF800000> : vector<8xf32>
    %65 = vector.multi_reduction <maximumf>, %64, %cst_27 [1] : vector<8x32xf32> to vector<8xf32>
    %66 = vector.shape_cast %65 : vector<8xf32> to vector<8x1xf32>
    %67 = vector.shape_cast %23 : vector<1x32xi1> to vector<1x32xi1>
    %68 = vector.broadcast %67 : vector<1x32xi1> to vector<8x32xi1>
    %69 = vector.shape_cast %66 : vector<8x1xf32> to vector<8x1xf32>
    %70 = vector.broadcast %69 : vector<8x1xf32> to vector<8x32xf32>
    %71 = arith.select %68, %70, %60 : vector<8x32xi1>, vector<8x32xf32>
    %cst_28 = arith.constant -3.40282347E+38 : f32
    %72 = vector.shape_cast %28 : vector<1x32xi1> to vector<1x32xi1>
    %73 = vector.broadcast %72 : vector<1x32xi1> to vector<8x32xi1>
    %74 = vector.broadcast %cst_28 : f32 to vector<8x32xf32>
    %75 = arith.select %73, %48, %74 : vector<8x32xi1>, vector<8x32xf32>
    %cst_29 = arith.constant dense<0xFF800000> : vector<8xf32>
    %76 = vector.multi_reduction <maximumf>, %75, %cst_29 [1] : vector<8x32xf32> to vector<8xf32>
    %77 = vector.shape_cast %76 : vector<8xf32> to vector<8x1xf32>
    %78 = vector.shape_cast %28 : vector<1x32xi1> to vector<1x32xi1>
    %79 = vector.broadcast %78 : vector<1x32xi1> to vector<8x32xi1>
    %80 = vector.shape_cast %77 : vector<8x1xf32> to vector<8x1xf32>
    %81 = vector.broadcast %80 : vector<8x1xf32> to vector<8x32xf32>
    %82 = arith.select %79, %81, %71 : vector<8x32xi1>, vector<8x32xf32>
    %cst_30 = arith.constant -3.40282347E+38 : f32
    %83 = vector.shape_cast %33 : vector<1x32xi1> to vector<1x32xi1>
    %84 = vector.broadcast %83 : vector<1x32xi1> to vector<8x32xi1>
    %85 = vector.broadcast %cst_30 : f32 to vector<8x32xf32>
    %86 = arith.select %84, %48, %85 : vector<8x32xi1>, vector<8x32xf32>
    %cst_31 = arith.constant dense<0xFF800000> : vector<8xf32>
    %87 = vector.multi_reduction <maximumf>, %86, %cst_31 [1] : vector<8x32xf32> to vector<8xf32>
    %88 = vector.shape_cast %87 : vector<8xf32> to vector<8x1xf32>
    %89 = vector.shape_cast %33 : vector<1x32xi1> to vector<1x32xi1>
    %90 = vector.broadcast %89 : vector<1x32xi1> to vector<8x32xi1>
    %91 = vector.shape_cast %88 : vector<8x1xf32> to vector<8x1xf32>
    %92 = vector.broadcast %91 : vector<8x1xf32> to vector<8x32xf32>
    %93 = arith.select %90, %92, %82 : vector<8x32xi1>, vector<8x32xf32>
    %94 = arith.subf %48, %93 : vector<8x32xf32>
    %95 = math.exp %94 : vector<8x32xf32>
    %cst_32 = arith.constant 0.000000e+00 : f32
    %96 = vector.broadcast %cst_32 : f32 to vector<8x32xf32>
    %cst_33 = arith.constant 0.000000e+00 : f32
    %97 = vector.shape_cast %18 : vector<1x32xi1> to vector<1x32xi1>
    %98 = vector.broadcast %97 : vector<1x32xi1> to vector<8x32xi1>
    %99 = vector.broadcast %cst_33 : f32 to vector<8x32xf32>
    %100 = arith.select %98, %95, %99 : vector<8x32xi1>, vector<8x32xf32>
    %cst_34 = arith.constant dense<0.000000e+00> : vector<8xf32>
    %101 = vector.multi_reduction <add>, %100, %cst_34 [1] : vector<8x32xf32> to vector<8xf32>
    %102 = vector.shape_cast %101 : vector<8xf32> to vector<8x1xf32>
    %103 = vector.shape_cast %18 : vector<1x32xi1> to vector<1x32xi1>
    %104 = vector.broadcast %103 : vector<1x32xi1> to vector<8x32xi1>
    %105 = vector.shape_cast %102 : vector<8x1xf32> to vector<8x1xf32>
    %106 = vector.broadcast %105 : vector<8x1xf32> to vector<8x32xf32>
    %107 = arith.select %104, %106, %96 : vector<8x32xi1>, vector<8x32xf32>
    %cst_35 = arith.constant 0.000000e+00 : f32
    %108 = vector.shape_cast %23 : vector<1x32xi1> to vector<1x32xi1>
    %109 = vector.broadcast %108 : vector<1x32xi1> to vector<8x32xi1>
    %110 = vector.broadcast %cst_35 : f32 to vector<8x32xf32>
    %111 = arith.select %109, %95, %110 : vector<8x32xi1>, vector<8x32xf32>
    %cst_36 = arith.constant dense<0.000000e+00> : vector<8xf32>
    %112 = vector.multi_reduction <add>, %111, %cst_36 [1] : vector<8x32xf32> to vector<8xf32>
    %113 = vector.shape_cast %112 : vector<8xf32> to vector<8x1xf32>
    %114 = vector.shape_cast %23 : vector<1x32xi1> to vector<1x32xi1>
    %115 = vector.broadcast %114 : vector<1x32xi1> to vector<8x32xi1>
    %116 = vector.shape_cast %113 : vector<8x1xf32> to vector<8x1xf32>
    %117 = vector.broadcast %116 : vector<8x1xf32> to vector<8x32xf32>
    %118 = arith.select %115, %117, %107 : vector<8x32xi1>, vector<8x32xf32>
    %cst_37 = arith.constant 0.000000e+00 : f32
    %119 = vector.shape_cast %28 : vector<1x32xi1> to vector<1x32xi1>
    %120 = vector.broadcast %119 : vector<1x32xi1> to vector<8x32xi1>
    %121 = vector.broadcast %cst_37 : f32 to vector<8x32xf32>
    %122 = arith.select %120, %95, %121 : vector<8x32xi1>, vector<8x32xf32>
    %cst_38 = arith.constant dense<0.000000e+00> : vector<8xf32>
    %123 = vector.multi_reduction <add>, %122, %cst_38 [1] : vector<8x32xf32> to vector<8xf32>
    %124 = vector.shape_cast %123 : vector<8xf32> to vector<8x1xf32>
    %125 = vector.shape_cast %28 : vector<1x32xi1> to vector<1x32xi1>
    %126 = vector.broadcast %125 : vector<1x32xi1> to vector<8x32xi1>
    %127 = vector.shape_cast %124 : vector<8x1xf32> to vector<8x1xf32>
    %128 = vector.broadcast %127 : vector<8x1xf32> to vector<8x32xf32>
    %129 = arith.select %126, %128, %118 : vector<8x32xi1>, vector<8x32xf32>
    %cst_39 = arith.constant 0.000000e+00 : f32
    %130 = vector.shape_cast %33 : vector<1x32xi1> to vector<1x32xi1>
    %131 = vector.broadcast %130 : vector<1x32xi1> to vector<8x32xi1>
    %132 = vector.broadcast %cst_39 : f32 to vector<8x32xf32>
    %133 = arith.select %131, %95, %132 : vector<8x32xi1>, vector<8x32xf32>
    %cst_40 = arith.constant dense<0.000000e+00> : vector<8xf32>
    %134 = vector.multi_reduction <add>, %133, %cst_40 [1] : vector<8x32xf32> to vector<8xf32>
    %135 = vector.shape_cast %134 : vector<8xf32> to vector<8x1xf32>
    %136 = vector.shape_cast %33 : vector<1x32xi1> to vector<1x32xi1>
    %137 = vector.broadcast %136 : vector<1x32xi1> to vector<8x32xi1>
    %138 = vector.shape_cast %135 : vector<8x1xf32> to vector<8x1xf32>
    %139 = vector.broadcast %138 : vector<8x1xf32> to vector<8x32xf32>
    %140 = arith.select %137, %139, %129 : vector<8x32xi1>, vector<8x32xf32>
    %141 = arith.divf %95, %140 : vector<8x32xf32>
    %142 = vector.extract_strided_slice %42 {offsets = [0, 32], sizes = [8, 32], strides = [1, 1]} : vector<8x64xf32> to vector<8x32xf32>
    %143 = arith.mulf %141, %142 : vector<8x32xf32>
    %144 = arith.addf %143, %1 : vector<8x32xf32>
    %cst_41 = arith.constant dense<0.000000e+00> : vector<8xf32>
    %145 = vector.multi_reduction <add>, %144, %cst_41 [1] : vector<8x32xf32> to vector<8xf32>
    %146 = vector.shape_cast %145 : vector<8xf32> to vector<8x1xf32>
    %cst_42 = arith.constant 3.200000e+01 : f32
    %147 = vector.broadcast %cst_42 : f32 to vector<8x1xf32>
    %148 = arith.divf %146, %147 : vector<8x1xf32>
    %149 = vector.broadcast %148 : vector<8x1xf32> to vector<8x32xf32>
    %150 = arith.subf %144, %149 : vector<8x32xf32>
    %151 = arith.mulf %150, %150 : vector<8x32xf32>
    %cst_43 = arith.constant dense<0.000000e+00> : vector<8xf32>
    %152 = vector.multi_reduction <add>, %151, %cst_43 [1] : vector<8x32xf32> to vector<8xf32>
    %153 = vector.shape_cast %152 : vector<8xf32> to vector<8x1xf32>
    %cst_44 = arith.constant 3.200000e+01 : f32
    %154 = vector.broadcast %cst_44 : f32 to vector<8x1xf32>
    %155 = arith.divf %153, %154 : vector<8x1xf32>
    %156 = vector.broadcast %148 : vector<8x1xf32> to vector<8x32xf32>
    %157 = arith.subf %144, %156 : vector<8x32xf32>
    %cst_45 = arith.constant 9.99999974E-6 : f32
    %158 = vector.broadcast %cst_45 : f32 to vector<8x1xf32>
    %159 = arith.addf %155, %158 : vector<8x1xf32>
    %160 = math.rsqrt %159 : vector<8x1xf32>
    %161 = vector.broadcast %160 : vector<8x1xf32> to vector<8x32xf32>
    %162 = arith.mulf %157, %161 : vector<8x32xf32>
    %163 = vector.broadcast %6 : vector<1x32xf32> to vector<8x32xf32>
    %164 = arith.mulf %162, %163 : vector<8x32xf32>
    %165 = vector.broadcast %7 : vector<1x32xf32> to vector<8x32xf32>
    %166 = arith.addf %164, %165 : vector<8x32xf32>
    %c0_46 = arith.constant 0 : index
    %c0_47 = arith.constant 0 : index
    %167 = vector.load %arg6[%c0_46, %c0_47] : memref<32x32xf32, #tpu.memory_space<vmem>>, vector<32x32xf32>
    %cst_48 = arith.constant dense<0.000000e+00> : vector<8x32xf32>
    %168 = tpu.matmul %166, %167, %cst_48 {dimension_numbers = #tpu.dot_dimension_numbers<[1], [0], [0], [1], [0, 0, 1, 1], [], []>} : vector<8x32xf32>, vector<32x32xf32>, vector<8x32xf32> -> vector<8x32xf32>
    %c0_49 = arith.constant 0 : index
    %c0_50 = arith.constant 0 : index
    %169 = vector.load %arg7[%c0_49, %c0_50] : memref<32x16xf32, #tpu.memory_space<vmem>>, vector<32x16xf32>
    %cst_51 = arith.constant dense<0.000000e+00> : vector<8x16xf32>
    %170 = tpu.matmul %2, %169, %cst_51 {dimension_numbers = #tpu.dot_dimension_numbers<[1], [0], [0], [1], [0, 0, 1, 1], [], []>} : vector<8x32xf32>, vector<32x16xf32>, vector<8x16xf32> -> vector<8x16xf32>
    %cst_52 = arith.constant dense<0.000000e+00> : vector<8x64xf32>
    %171 = tpu.matmul %170, %12, %cst_52 {dimension_numbers = #tpu.dot_dimension_numbers<[1], [0], [0], [1], [0, 0, 1, 1], [], []>} : vector<8x16xf32>, vector<16x64xf32>, vector<8x64xf32> -> vector<8x64xf32>
    %172 = vector.extract_strided_slice %171 {offsets = [0, 0], sizes = [8, 32], strides = [1, 1]} : vector<8x64xf32> to vector<8x32xf32>
    %173 = arith.mulf %168, %172 : vector<8x32xf32>
    %174 = vector.broadcast %37 : f32 to vector<8x32xf32>
    %175 = arith.mulf %173, %174 : vector<8x32xf32>
    %176 = vector.broadcast %35 : f32 to vector<8x32xf32>
    %177 = arith.mulf %175, %176 : vector<8x32xf32>
    %cst_53 = arith.constant 0.000000e+00 : f32
    %178 = vector.broadcast %cst_53 : f32 to vector<8x32xf32>
    %cst_54 = arith.constant -3.40282347E+38 : f32
    %179 = vector.shape_cast %18 : vector<1x32xi1> to vector<1x32xi1>
    %180 = vector.broadcast %179 : vector<1x32xi1> to vector<8x32xi1>
    %181 = vector.broadcast %cst_54 : f32 to vector<8x32xf32>
    %182 = arith.select %180, %177, %181 : vector<8x32xi1>, vector<8x32xf32>
    %cst_55 = arith.constant dense<0xFF800000> : vector<8xf32>
    %183 = vector.multi_reduction <maximumf>, %182, %cst_55 [1] : vector<8x32xf32> to vector<8xf32>
    %184 = vector.shape_cast %183 : vector<8xf32> to vector<8x1xf32>
    %185 = vector.shape_cast %18 : vector<1x32xi1> to vector<1x32xi1>
    %186 = vector.broadcast %185 : vector<1x32xi1> to vector<8x32xi1>
    %187 = vector.shape_cast %184 : vector<8x1xf32> to vector<8x1xf32>
    %188 = vector.broadcast %187 : vector<8x1xf32> to vector<8x32xf32>
    %189 = arith.select %186, %188, %178 : vector<8x32xi1>, vector<8x32xf32>
    %cst_56 = arith.constant -3.40282347E+38 : f32
    %190 = vector.shape_cast %23 : vector<1x32xi1> to vector<1x32xi1>
    %191 = vector.broadcast %190 : vector<1x32xi1> to vector<8x32xi1>
    %192 = vector.broadcast %cst_56 : f32 to vector<8x32xf32>
    %193 = arith.select %191, %177, %192 : vector<8x32xi1>, vector<8x32xf32>
    %cst_57 = arith.constant dense<0xFF800000> : vector<8xf32>
    %194 = vector.multi_reduction <maximumf>, %193, %cst_57 [1] : vector<8x32xf32> to vector<8xf32>
    %195 = vector.shape_cast %194 : vector<8xf32> to vector<8x1xf32>
    %196 = vector.shape_cast %23 : vector<1x32xi1> to vector<1x32xi1>
    %197 = vector.broadcast %196 : vector<1x32xi1> to vector<8x32xi1>
    %198 = vector.shape_cast %195 : vector<8x1xf32> to vector<8x1xf32>
    %199 = vector.broadcast %198 : vector<8x1xf32> to vector<8x32xf32>
    %200 = arith.select %197, %199, %189 : vector<8x32xi1>, vector<8x32xf32>
    %cst_58 = arith.constant -3.40282347E+38 : f32
    %201 = vector.shape_cast %28 : vector<1x32xi1> to vector<1x32xi1>
    %202 = vector.broadcast %201 : vector<1x32xi1> to vector<8x32xi1>
    %203 = vector.broadcast %cst_58 : f32 to vector<8x32xf32>
    %204 = arith.select %202, %177, %203 : vector<8x32xi1>, vector<8x32xf32>
    %cst_59 = arith.constant dense<0xFF800000> : vector<8xf32>
    %205 = vector.multi_reduction <maximumf>, %204, %cst_59 [1] : vector<8x32xf32> to vector<8xf32>
    %206 = vector.shape_cast %205 : vector<8xf32> to vector<8x1xf32>
    %207 = vector.shape_cast %28 : vector<1x32xi1> to vector<1x32xi1>
    %208 = vector.broadcast %207 : vector<1x32xi1> to vector<8x32xi1>
    %209 = vector.shape_cast %206 : vector<8x1xf32> to vector<8x1xf32>
    %210 = vector.broadcast %209 : vector<8x1xf32> to vector<8x32xf32>
    %211 = arith.select %208, %210, %200 : vector<8x32xi1>, vector<8x32xf32>
    %cst_60 = arith.constant -3.40282347E+38 : f32
    %212 = vector.shape_cast %33 : vector<1x32xi1> to vector<1x32xi1>
    %213 = vector.broadcast %212 : vector<1x32xi1> to vector<8x32xi1>
    %214 = vector.broadcast %cst_60 : f32 to vector<8x32xf32>
    %215 = arith.select %213, %177, %214 : vector<8x32xi1>, vector<8x32xf32>
    %cst_61 = arith.constant dense<0xFF800000> : vector<8xf32>
    %216 = vector.multi_reduction <maximumf>, %215, %cst_61 [1] : vector<8x32xf32> to vector<8xf32>
    %217 = vector.shape_cast %216 : vector<8xf32> to vector<8x1xf32>
    %218 = vector.shape_cast %33 : vector<1x32xi1> to vector<1x32xi1>
    %219 = vector.broadcast %218 : vector<1x32xi1> to vector<8x32xi1>
    %220 = vector.shape_cast %217 : vector<8x1xf32> to vector<8x1xf32>
    %221 = vector.broadcast %220 : vector<8x1xf32> to vector<8x32xf32>
    %222 = arith.select %219, %221, %211 : vector<8x32xi1>, vector<8x32xf32>
    %223 = arith.subf %177, %222 : vector<8x32xf32>
    %224 = math.exp %223 : vector<8x32xf32>
    %cst_62 = arith.constant 0.000000e+00 : f32
    %225 = vector.broadcast %cst_62 : f32 to vector<8x32xf32>
    %cst_63 = arith.constant 0.000000e+00 : f32
    %226 = vector.shape_cast %18 : vector<1x32xi1> to vector<1x32xi1>
    %227 = vector.broadcast %226 : vector<1x32xi1> to vector<8x32xi1>
    %228 = vector.broadcast %cst_63 : f32 to vector<8x32xf32>
    %229 = arith.select %227, %224, %228 : vector<8x32xi1>, vector<8x32xf32>
    %cst_64 = arith.constant dense<0.000000e+00> : vector<8xf32>
    %230 = vector.multi_reduction <add>, %229, %cst_64 [1] : vector<8x32xf32> to vector<8xf32>
    %231 = vector.shape_cast %230 : vector<8xf32> to vector<8x1xf32>
    %232 = vector.shape_cast %18 : vector<1x32xi1> to vector<1x32xi1>
    %233 = vector.broadcast %232 : vector<1x32xi1> to vector<8x32xi1>
    %234 = vector.shape_cast %231 : vector<8x1xf32> to vector<8x1xf32>
    %235 = vector.broadcast %234 : vector<8x1xf32> to vector<8x32xf32>
    %236 = arith.select %233, %235, %225 : vector<8x32xi1>, vector<8x32xf32>
    %cst_65 = arith.constant 0.000000e+00 : f32
    %237 = vector.shape_cast %23 : vector<1x32xi1> to vector<1x32xi1>
    %238 = vector.broadcast %237 : vector<1x32xi1> to vector<8x32xi1>
    %239 = vector.broadcast %cst_65 : f32 to vector<8x32xf32>
    %240 = arith.select %238, %224, %239 : vector<8x32xi1>, vector<8x32xf32>
    %cst_66 = arith.constant dense<0.000000e+00> : vector<8xf32>
    %241 = vector.multi_reduction <add>, %240, %cst_66 [1] : vector<8x32xf32> to vector<8xf32>
    %242 = vector.shape_cast %241 : vector<8xf32> to vector<8x1xf32>
    %243 = vector.shape_cast %23 : vector<1x32xi1> to vector<1x32xi1>
    %244 = vector.broadcast %243 : vector<1x32xi1> to vector<8x32xi1>
    %245 = vector.shape_cast %242 : vector<8x1xf32> to vector<8x1xf32>
    %246 = vector.broadcast %245 : vector<8x1xf32> to vector<8x32xf32>
    %247 = arith.select %244, %246, %236 : vector<8x32xi1>, vector<8x32xf32>
    %cst_67 = arith.constant 0.000000e+00 : f32
    %248 = vector.shape_cast %28 : vector<1x32xi1> to vector<1x32xi1>
    %249 = vector.broadcast %248 : vector<1x32xi1> to vector<8x32xi1>
    %250 = vector.broadcast %cst_67 : f32 to vector<8x32xf32>
    %251 = arith.select %249, %224, %250 : vector<8x32xi1>, vector<8x32xf32>
    %cst_68 = arith.constant dense<0.000000e+00> : vector<8xf32>
    %252 = vector.multi_reduction <add>, %251, %cst_68 [1] : vector<8x32xf32> to vector<8xf32>
    %253 = vector.shape_cast %252 : vector<8xf32> to vector<8x1xf32>
    %254 = vector.shape_cast %28 : vector<1x32xi1> to vector<1x32xi1>
    %255 = vector.broadcast %254 : vector<1x32xi1> to vector<8x32xi1>
    %256 = vector.shape_cast %253 : vector<8x1xf32> to vector<8x1xf32>
    %257 = vector.broadcast %256 : vector<8x1xf32> to vector<8x32xf32>
    %258 = arith.select %255, %257, %247 : vector<8x32xi1>, vector<8x32xf32>
    %cst_69 = arith.constant 0.000000e+00 : f32
    %259 = vector.shape_cast %33 : vector<1x32xi1> to vector<1x32xi1>
    %260 = vector.broadcast %259 : vector<1x32xi1> to vector<8x32xi1>
    %261 = vector.broadcast %cst_69 : f32 to vector<8x32xf32>
    %262 = arith.select %260, %224, %261 : vector<8x32xi1>, vector<8x32xf32>
    %cst_70 = arith.constant dense<0.000000e+00> : vector<8xf32>
    %263 = vector.multi_reduction <add>, %262, %cst_70 [1] : vector<8x32xf32> to vector<8xf32>
    %264 = vector.shape_cast %263 : vector<8xf32> to vector<8x1xf32>
    %265 = vector.shape_cast %33 : vector<1x32xi1> to vector<1x32xi1>
    %266 = vector.broadcast %265 : vector<1x32xi1> to vector<8x32xi1>
    %267 = vector.shape_cast %264 : vector<8x1xf32> to vector<8x1xf32>
    %268 = vector.broadcast %267 : vector<8x1xf32> to vector<8x32xf32>
    %269 = arith.select %266, %268, %258 : vector<8x32xi1>, vector<8x32xf32>
    %270 = arith.divf %224, %269 : vector<8x32xf32>
    %271 = vector.extract_strided_slice %171 {offsets = [0, 32], sizes = [8, 32], strides = [1, 1]} : vector<8x64xf32> to vector<8x32xf32>
    %272 = arith.mulf %270, %271 : vector<8x32xf32>
    %273 = arith.addf %272, %166 : vector<8x32xf32>
    %cst_71 = arith.constant dense<0.000000e+00> : vector<8xf32>
    %274 = vector.multi_reduction <add>, %273, %cst_71 [1] : vector<8x32xf32> to vector<8xf32>
    %275 = vector.shape_cast %274 : vector<8xf32> to vector<8x1xf32>
    %cst_72 = arith.constant 3.200000e+01 : f32
    %276 = vector.broadcast %cst_72 : f32 to vector<8x1xf32>
    %277 = arith.divf %275, %276 : vector<8x1xf32>
    %278 = vector.broadcast %277 : vector<8x1xf32> to vector<8x32xf32>
    %279 = arith.subf %273, %278 : vector<8x32xf32>
    %280 = arith.mulf %279, %279 : vector<8x32xf32>
    %cst_73 = arith.constant dense<0.000000e+00> : vector<8xf32>
    %281 = vector.multi_reduction <add>, %280, %cst_73 [1] : vector<8x32xf32> to vector<8xf32>
    %282 = vector.shape_cast %281 : vector<8xf32> to vector<8x1xf32>
    %cst_74 = arith.constant 3.200000e+01 : f32
    %283 = vector.broadcast %cst_74 : f32 to vector<8x1xf32>
    %284 = arith.divf %282, %283 : vector<8x1xf32>
    %285 = vector.broadcast %277 : vector<8x1xf32> to vector<8x32xf32>
    %286 = arith.subf %273, %285 : vector<8x32xf32>
    %cst_75 = arith.constant 9.99999974E-6 : f32
    %287 = vector.broadcast %cst_75 : f32 to vector<8x1xf32>
    %288 = arith.addf %284, %287 : vector<8x1xf32>
    %289 = math.rsqrt %288 : vector<8x1xf32>
    %290 = vector.broadcast %289 : vector<8x1xf32> to vector<8x32xf32>
    %291 = arith.mulf %286, %290 : vector<8x32xf32>
    %292 = vector.broadcast %8 : vector<1x32xf32> to vector<8x32xf32>
    %293 = arith.mulf %291, %292 : vector<8x32xf32>
    %294 = vector.broadcast %9 : vector<1x32xf32> to vector<8x32xf32>
    %295 = arith.addf %293, %294 : vector<8x32xf32>
    %c0_76 = arith.constant 0 : index
    %c0_77 = arith.constant 0 : index
    %296 = vector.load %arg9[%c0_76, %c0_77] : memref<32x64xf32, #tpu.memory_space<vmem>>, vector<32x64xf32>
    %cst_78 = arith.constant dense<0.000000e+00> : vector<8x64xf32>
    %297 = tpu.matmul %295, %296, %cst_78 {dimension_numbers = #tpu.dot_dimension_numbers<[1], [0], [0], [1], [0, 0, 1, 1], [], []>} : vector<8x32xf32>, vector<32x64xf32>, vector<8x64xf32> -> vector<8x64xf32>
    %298 = vector.broadcast %4 : vector<1x64xf32> to vector<8x64xf32>
    %299 = arith.addf %297, %298 : vector<8x64xf32>
    %cst_79 = arith.constant 0.000000e+00 : f32
    %300 = vector.broadcast %cst_79 : f32 to vector<8x64xf32>
    %301 = arith.maximumf %299, %300 : vector<8x64xf32>
    %c0_80 = arith.constant 0 : index
    %c0_81 = arith.constant 0 : index
    %302 = vector.load %arg10[%c0_80, %c0_81] : memref<64x32xf32, #tpu.memory_space<vmem>>, vector<64x32xf32>
    %cst_82 = arith.constant dense<0.000000e+00> : vector<8x32xf32>
    %303 = tpu.matmul %301, %302, %cst_82 {dimension_numbers = #tpu.dot_dimension_numbers<[1], [0], [0], [1], [0, 0, 1, 1], [], []>} : vector<8x64xf32>, vector<64x32xf32>, vector<8x32xf32> -> vector<8x32xf32>
    %304 = vector.broadcast %5 : vector<1x32xf32> to vector<8x32xf32>
    %305 = arith.addf %303, %304 : vector<8x32xf32>
    %306 = arith.addf %305, %295 : vector<8x32xf32>
    %cst_83 = arith.constant dense<0.000000e+00> : vector<8xf32>
    %307 = vector.multi_reduction <add>, %306, %cst_83 [1] : vector<8x32xf32> to vector<8xf32>
    %308 = vector.shape_cast %307 : vector<8xf32> to vector<8x1xf32>
    %cst_84 = arith.constant 3.200000e+01 : f32
    %309 = vector.broadcast %cst_84 : f32 to vector<8x1xf32>
    %310 = arith.divf %308, %309 : vector<8x1xf32>
    %311 = vector.broadcast %310 : vector<8x1xf32> to vector<8x32xf32>
    %312 = arith.subf %306, %311 : vector<8x32xf32>
    %313 = arith.mulf %312, %312 : vector<8x32xf32>
    %cst_85 = arith.constant dense<0.000000e+00> : vector<8xf32>
    %314 = vector.multi_reduction <add>, %313, %cst_85 [1] : vector<8x32xf32> to vector<8xf32>
    %315 = vector.shape_cast %314 : vector<8xf32> to vector<8x1xf32>
    %cst_86 = arith.constant 3.200000e+01 : f32
    %316 = vector.broadcast %cst_86 : f32 to vector<8x1xf32>
    %317 = arith.divf %315, %316 : vector<8x1xf32>
    %318 = vector.broadcast %310 : vector<8x1xf32> to vector<8x32xf32>
    %319 = arith.subf %306, %318 : vector<8x32xf32>
    %cst_87 = arith.constant 9.99999974E-6 : f32
    %320 = vector.broadcast %cst_87 : f32 to vector<8x1xf32>
    %321 = arith.addf %317, %320 : vector<8x1xf32>
    %322 = math.rsqrt %321 : vector<8x1xf32>
    %323 = vector.broadcast %322 : vector<8x1xf32> to vector<8x32xf32>
    %324 = arith.mulf %319, %323 : vector<8x32xf32>
    %325 = vector.broadcast %10 : vector<1x32xf32> to vector<8x32xf32>
    %326 = arith.mulf %324, %325 : vector<8x32xf32>
    %327 = vector.broadcast %11 : vector<1x32xf32> to vector<8x32xf32>
    %328 = arith.addf %326, %327 : vector<8x32xf32>
    %cst_88 = arith.constant dense<0.000000e+00> : vector<32xf32>
    %329 = vector.multi_reduction <add>, %328, %cst_88 [0] : vector<8x32xf32> to vector<32xf32>
    %330 = vector.shape_cast %329 : vector<32xf32> to vector<1x32xf32>
    %c0_89 = arith.constant 0 : index
    %c0_90 = arith.constant 0 : index
    %331 = vector.load %arg12[%c0_89, %c0_90] : memref<1x32xf32, #tpu.memory_space<vmem>>, vector<1x32xf32>
    tpu.vector_store %arg12[%c0_89, %c0_90], %330 {strides = array<i32>} : memref<1x32xf32, #tpu.memory_space<vmem>>, vector<1x32xf32>,
    return
  }
  func.func @transform_0(%arg0: i32) -> (i32, i32) {
    %c0_i32 = arith.constant 0 : i32
    %c0_i32_0 = arith.constant 0 : i32
    return %arg0, %c0_i32 : i32, i32
  }
  func.func @transform_1(%arg0: i32) -> (i32, i32) {
    %c0_i32 = arith.constant 0 : i32
    %c0_i32_0 = arith.constant 0 : i32
    return %arg0, %c0_i32 : i32, i32
  }
  func.func @transform_2(%arg0: i32) -> (i32, i32) {
    %c0_i32 = arith.constant 0 : i32
    %c0_i32_0 = arith.constant 0 : i32
    return %arg0, %c0_i32 : i32, i32
  }
  func.func @transform_3(%arg0: i32) -> (i32, i32) {
    %c0_i32 = arith.constant 0 : i32
    %c0_i32_0 = arith.constant 0 : i32
    %c0_i32_1 = arith.constant 0 : i32
    return %c0_i32, %c0_i32_0 : i32, i32
  }
  func.func @transform_4(%arg0: i32) -> (i32, i32) {
    %c0_i32 = arith.constant 0 : i32
    %c0_i32_0 = arith.constant 0 : i32
    %c0_i32_1 = arith.constant 0 : i32
    return %c0_i32, %c0_i32_0 : i32, i32
  }
  func.func @transform_5(%arg0: i32) -> (i32, i32) {
    %c0_i32 = arith.constant 0 : i32
    %c0_i32_0 = arith.constant 0 : i32
    %c0_i32_1 = arith.constant 0 : i32
    return %c0_i32, %c0_i32_0 : i32, i32
  }
  func.func @transform_6(%arg0: i32) -> (i32, i32) {
    %c0_i32 = arith.constant 0 : i32
    %c0_i32_0 = arith.constant 0 : i32
    %c0_i32_1 = arith.constant 0 : i32
    return %c0_i32, %c0_i32_0 : i32, i32
  }
  func.func @transform_7(%arg0: i32) -> (i32, i32) {
    %c0_i32 = arith.constant 0 : i32
    %c0_i32_0 = arith.constant 0 : i32
    %c0_i32_1 = arith.constant 0 : i32
    return %c0_i32, %c0_i32_0 : i32, i32
  }
  func.func @transform_8(%arg0: i32) -> (i32, i32) {
    %c0_i32 = arith.constant 0 : i32
    %c0_i32_0 = arith.constant 0 : i32
    %c0_i32_1 = arith.constant 0 : i32
    return %c0_i32, %c0_i32_0 : i32, i32
  }
  func.func @transform_9(%arg0: i32) -> (i32, i32) {
    %c0_i32 = arith.constant 0 : i32
    %c0_i32_0 = arith.constant 0 : i32
    %c0_i32_1 = arith.constant 0 : i32
    return %c0_i32, %c0_i32_0 : i32, i32
  }
  func.func @transform_10(%arg0: i32) -> (i32, i32) {
    %c0_i32 = arith.constant 0 : i32
    %c0_i32_0 = arith.constant 0 : i32
    %c0_i32_1 = arith.constant 0 : i32
    return %c0_i32, %c0_i32_0 : i32, i32
  }
  func.func @transform_11(%arg0: i32) -> (i32, i32) {
    %c0_i32 = arith.constant 0 : i32
    %c0_i32_0 = arith.constant 0 : i32
    return %arg0, %c0_i32 : i32, i32
  }
}

</mosaic_0001>

<bundles_post_ra>
// kernel: tpu_custom_call.1
= control target key start
LH: loop header
LB: loop body
LE: loop exit
PB: predicated region body
PF: predicated region fallthrough
CT: control target
= control target key end

     0   :  { %v1068_v1 = vmov 0.0   ;;  %vm1069_vm0 = vmmov 0   ;;  %s1436_s0 = inlined_call_operand.vmem [shape: f32[8,32], index: 0, kind: input, shape index: {}]   ;;  %s1437_s1 = inlined_call_operand.vmem [shape: f32[8,32], index: 1, kind: input, shape index: {}]   ;;  %s1438_s2 = inlined_call_operand.vmem [shape: f32[8,32], index: 2, kind: input, shape index: {}]   ;;  %s1439_s3 = inlined_call_operand.vmem [shape: f32[32,32], index: 3, kind: input, shape index: {}]   ;;  %s1440_s4 = inlined_call_operand.vmem [shape: f32[32,16], index: 4, kind: input, shape index: {}]   ;;  %s1441_s5 = inlined_call_operand.vmem [shape: f32[32,32], index: 5, kind: input, shape index: {}]   ;;  %s1442_s6 = inlined_call_operand.vmem [shape: f32[32,16], index: 6, kind: input, shape index: {}]   ;;  %s1443_s7 = inlined_call_operand.vmem [shape: f32[16,64], index: 7, kind: input, shape index: {}]   ;;  %s1444_s8 = inlined_call_operand.vmem [shape: f32[32,64], index: 8, kind: input, shape index: {}]   ;;  %s1445_s9 = inlined_call_operand.vmem [shape: f32[64,32], index: 9, kind: input, shape index: {}]   ;;  %s1446_s10 = inlined_call_operand.vmem [shape: f32[8,64], index: 10, kind: input, shape index: {}]   ;;  %s1447_s11 = inlined_call_operand.hbm [shape: f32[1,32], index: 11, kind: output, shape index: {}]  }
   0x1   :  { %v140_v0 = vld [vmem:[%s1440_s4 + $0x18] sm:$0xff]  ;;  %951 = vmatprep.subr.mxu1 %v1068_v1  ;;  %v139_v2 = vld [vmem:[%s1440_s4 + $0x10] sm:$0xff]  ;;  %959 = vmatprep.mubr.msk.f32.mxu1 %vm1069_vm0, %v1068_v1  ;;  %v138_v5 = vld [vmem:[%s1440_s4 + $0x8] sm:$0xff] }
   0x2   :  { %v62_v3 = vld [vmem:[%s1439_s3 + $0x18] sm:$0xff]  ;;  %952 = vmatpush3.msra.mxu1 %v140_v0  ;;  %940 = vmatprep.subr.mxu0 %v1068_v1  ;;  %v61_v4 = vld [vmem:[%s1439_s3 + $0x10] sm:$0xff]  ;;  %v60_v6 = vld [vmem:[%s1439_s3 + $0x8] sm:$0xff] }
   0x3   :  { %953 = vmatprep.subr.mxu1 %v1068_v1  ;;  %941 = vmatpush3.msra.mxu0 %v62_v3 }
   0x4   :  { %954 = vmatpush3.msra.mxu1 %v139_v2  ;;  %942 = vmatprep.subr.mxu0 %v1068_v1 }
   0x5   :  { %16 = vsyncpa [#allocation3], 0  ;;  %955 = vmatprep.subr.mxu1 %v1068_v1  ;;  %v137_v7 = vld [vmem:[%s1440_s4] sm:$0xff]  ;;  %943 = vmatpush3.msra.mxu0 %v61_v4  ;;  %vm63_vm1 = vcmask 261120   ;;  %v1178_v11 = vld [vmem:[%s1443_s7 + $0x8] sm:$0xff]  ;;  %vm214_vm2 = vcmask 130048   ;;  %v45_v17 = vlaneseq }
   0x6   :  { %956 = vmatpush3.msra.mxu1 %v138_v5  ;;  %v39_v8 = vld [vmem:[%s1436_s0] sm:$0xff]  ;;  %944 = vmatprep.subr.mxu0 %v1068_v1  ;;  %v453_v53 = vld [vmem:[%s1442_s6 + $0x18] sm:$0xff]  ;;  %v452_v54 = vld [vmem:[%s1442_s6 + $0x10] sm:$0xff]  ;;  %vm771_vm13 = vcmask 523264   ;;  %vm876_vm14 = vcmask 253952  }
   0x7   :  { %v59_v9 = vld [vmem:[%s1439_s3] sm:$0xff]  ;;  %957 = vmatprep.subr.mxu1 %v1068_v1  ;;  %945 = vmatpush3.msra.mxu0 %v60_v6  ;;  %v1203_v18 = vand.u32 127, %v45_v17  ;;  %v451_v55 = vld [vmem:[%s1442_s6 + $0x8] sm:$0xff]  ;;  %v680_v24 = vld [vmem:[%s1444_s8 + $0x18] sm:$0xff] }
   0x8   :  { %958 = vmatpush3.msra.mxu1 %v137_v7  ;;  %946 = vmatprep.subr.mxu0 %v1068_v1  ;;  %v1172_v10 = vld [vmem:[%s1437_s1] sm:$0xff]  ;;  %s1070_s1 = smov 96  }
   0x9   :  { %960 = vmatmul.mubr.msk.f32.vlgmr.msra.gmra.mxu1 %vm63_vm1, %v39_v8  ;;  %947 = vmatpush3.msra.mxu0 %v59_v9  ;;  %v1188_v12 = vld [vmem:[%s1443_s7] sm:$0xff]  ;;  %vm53_vm3 = vcmp.ge.s32.totalorder %v1203_v18, 16  ;;  %vm54_vm4 = vcmp.lt.s32.totalorder %v1203_v18, 24  ;;  %vm56_vm5 = vcmp.ge.s32.totalorder %v1203_v18, 24  ;;  %vm57_vm6 = vcmp.lt.s32.totalorder %v1203_v18, 32 }
   0xa   :  { %948 = vmatprep.mubr.msk.f32.mxu0 %vm1069_vm0, %v1068_v1  ;;  %962 = vmatprep.subr.mxu0 %v1068_v1  ;;  %vm50_vm7 = vcmp.ge.s32.totalorder %v1203_v18, 8  ;;  %vm51_vm8 = vcmp.lt.s32.totalorder %v1203_v18, 16  ;;  %vm1211_vm9 = vmand %vm53_vm3, %vm54_vm4  ;;  %vm48_vm10 = vcmp.lt.s32.totalorder %v1203_v18, 8  ;;  %v450_v56 = vld [vmem:[%s1442_s6] sm:$0xff] }
   0xb   :  { %949 = vmatmul.mubr.msk.f32.vlgmr.msra.gmra.mxu0 %vm63_vm1, %v1172_v10  ;;  %969 = vmatprep.subr.mxu1 %v1068_v1  ;;  %vm1216_vm11 = vmand %vm56_vm5, %vm57_vm6  ;;  %v41_v57 = vld [vmem:[%s1438_s2] sm:$0xff] }
   0xc   :  { %963 = vmatpush3.msra.mxu0 %v1178_v11  ;;  %966 = vmatprep.mubr.msk.f32.mxu0 %vm1069_vm0, %v1068_v1  ;;  %vm1220_vm12 = vmand %vm50_vm7, %vm51_vm8 }
   0xd   :  { %964 = vmatprep.subr.mxu0 %v1068_v1  ;;  %977 = vmatprep.mubr.msk.f32.mxu1 %vm1069_vm0, %v1068_v1 }
   0xe   :  { %965 = vmatpush3.msra.mxu0 %v1188_v12 }
   0xf   :  { %980 = vmatprep.subr.mxu0 %v1068_v1 }
  0xc9   :  { %v210_v13 = vpop.f32.mrf.mxu1 }
  0xca   :  { %967 = vmatmul.mubr.msk.f32.vlgmr.msra.gmra.mxu0 %vm214_vm2, %v210_v13 }
  0xcb   :  { %v961_v14 = vpop.f32.mrf.mxu1  ;;  %v133_v15 = vpop.f32.mrf.mxu0  ;;  %988 = vmatprep.mubr.msk.f32.mxu0 %vm1069_vm0, %v1068_v1  ;;  %981 = vmatpush3.msra.mxu0 %v453_v53 }
  0xcc   :  { %982 = vmatprep.subr.mxu0 %v1068_v1 }
  0xcd   :  { %v950_v16 = vpop.f32.mrf.mxu0  ;;  %983 = vmatpush3.msra.mxu0 %v452_v54 }
  0xce   :  { %984 = vmatprep.subr.mxu0 %v1068_v1  ;;  %v375_v16 = vld [vmem:[%s1441_s5 + $0x10] sm:$0xff] }
  0xcf   :  { %985 = vmatpush3.msra.mxu0 %v451_v55 }
  0xd0   :  { %986 = vmatprep.subr.mxu0 %v1068_v1 }
  0xd1   :  { %987 = vmatpush3.msra.mxu0 %v450_v56 }
  0xd2   :  { %989 = vmatmul.mubr.msk.f32.vlgmr.msra.gmra.mxu0 %vm63_vm1, %v41_v57  ;;  %991 = vmatprep.subr.mxu0 %v1068_v1 }
  0xd3   :  { %992 = vmatpush3.msra.mxu0 %v1178_v11  ;;  %995 = vmatprep.mubr.msk.f32.mxu0 %vm1069_vm0, %v1068_v1 }
  0xd4   :  { %993 = vmatprep.subr.mxu0 %v1068_v1 }
  0xd5   :  { %994 = vmatpush3.msra.mxu0 %v1188_v12 }
  0xd6   :  { %998 = vmatprep.subr.mxu0 %v1068_v1 }
 0x18a   :  { %v284_v19 = vpop.f32.mrf.mxu0 }
 0x18b   :  { %v288_v20 = vmul.f32 %v284_v19, %v133_v15  ;;  %v376_v15 = vld [vmem:[%s1441_s5 + $0x18] sm:$0xff] }
 0x18c   :  { %v968_v21 = vpop.f32.mrf.mxu0  ;;  %970 = vmatpush3.msra.mxu1 %v376_v15 }
 0x18d   :  { %v289_v23 = vmul.f32 0.17677669, %v288_v20  ;;  %971 = vmatprep.subr.mxu1 %v1068_v1  ;;  %v373_v21 = vld [vmem:[%s1441_s5] sm:$0xff] }
 0x18e   :  { %972 = vmatpush3.msra.mxu1 %v375_v16 }
 0x18f   :  { %v306_v26 = vsel %vm1211_vm9, %v289_v23, -3.4028235e+38  ;;  %v292_v27 = vsel %vm48_vm10, %v289_v23, -3.4028235e+38  ;;  %v313_v30 = vsel %vm1216_vm11, %v289_v23, -3.4028235e+38  ;;  %973 = vmatprep.subr.mxu1 %v1068_v1 }
 0x190   :  { %v307_v28 = vsel %vm63_vm1, %v306_v26, -inf  ;;  %v293_v29 = vsel %vm63_vm1, %v292_v27, -inf  ;;  %v299_v31 = vsel %vm1220_vm12, %v289_v23, -3.4028235e+38  ;;  %v314_v32 = vsel %vm63_vm1, %v313_v30, -inf  ;;  %v1320_v30 = vld [vmem:[%s1446_s10] sm:$0xff] }
 0x191   :  { %308 = vmax.xlane.f32.xlu1 %v307_v28  ;;  %294 = vmax.xlane.f32.xlu0 %v293_v29  ;;  %v300_v33 = vsel %vm63_vm1, %v299_v31, -inf  ;;  %v1314_v28 = vshrl.u32 %v45_v17, 7 }
 0x193   :  { %v365_v29 = vsub.s32 2, %v1314_v28  ;;  %v370_v31 = vsub.s32 3, %v1314_v28 }
 0x195   :  { %315 = vmax.xlane.f32.xlu1 %v314_v32  ;;  %301 = vmax.xlane.f32.xlu0 %v300_v33  ;;  %v366_v32 = vrot.slane %v1320_v30, %v365_v29 }
 0x21a   :  { %v309_v34 = vpop.xlane.xlu1 %308  ;;  %v295_v35 = vpop.xlane.xlu0 %294 }
 0x21b   :  { %v296_v36 = vsel %vm48_vm10, %v295_v35, 0.0  ;;  %v371_v35 = vrot.slane %v1320_v30, %v370_v31  ;;  %v679_v31 = vld [vmem:[%s1444_s8 + $0x10] sm:$0xff] }
 0x21e   :  { %v302_v37 = vpop.xlane.xlu0 %301  ;;  %v316_v39 = vpop.xlane.xlu1 %315 }
 0x21f   :  { %v303_v38 = vsel %vm1220_vm12, %v302_v37, %v296_v36 }
 0x220   :  { %v310_v40 = vsel %vm1211_vm9, %v309_v34, %v303_v38 }
 0x221   :  { %v317_v41 = vsel %vm1216_vm11, %v316_v39, %v310_v40 }
 0x222   :  { %v318_v42 = vsub.f32 %v289_v23, %v317_v41 }
 0x224   :  { %v319_v43 = vmul.f32 1.442695, %v318_v42 }
 0x226   :  { %1032 = vpow2.f32 %v319_v43 }
 0x233   :  { %v1033_v44 = vpop.eup %1032 }
 0x234   :  { %v326_v45 = vsel %vm1220_vm12, %v1033_v44, 0.0  ;;  %v321_v46 = vsel %vm48_vm10, %v1033_v44, 0.0  ;;  %v336_v49 = vsel %vm1216_vm11, %v1033_v44, 0.0  ;;  %v331_v50 = vsel %vm1211_vm9, %v1033_v44, 0.0 }
 0x235   :  { %v327_v47 = vsel %vm63_vm1, %v326_v45, 0.0  ;;  %v322_v48 = vsel %vm63_vm1, %v321_v46, 0.0  ;;  %v337_v51 = vsel %vm63_vm1, %v336_v49, 0.0  ;;  %v332_v52 = vsel %vm63_vm1, %v331_v50, 0.0 }
 0x236   :  { %328 = vadd.xlane.f32.xlu1 %v327_v47  ;;  %323 = vadd.xlane.f32.xlu0 %v322_v48 }
 0x23a   :  { %338 = vadd.xlane.f32.xlu1 %v337_v51  ;;  %333 = vadd.xlane.f32.xlu0 %v332_v52 }
 0x250   :  { %344 = vrot.lane.b32.xlu0 %v284_v19, %s1070_s1  ;;  %v374_v19 = vld [vmem:[%s1441_s5 + $0x8] sm:$0xff] }
 0x251   :  { %974 = vmatpush3.msra.mxu1 %v374_v19 }
 0x252   :  { %975 = vmatprep.subr.mxu1 %v1068_v1 }
 0x253   :  { %976 = vmatpush3.msra.mxu1 %v373_v21 }
 0x254   :  { %1009 = vmatprep.subr.mxu1 %v1068_v1 }
 0x2bf   :  { %v329_v58 = vpop.xlane.xlu1 %328  ;;  %v324_v59 = vpop.xlane.xlu0 %323 }
 0x2c0   :  { %v325_v60 = vsel %vm48_vm10, %v324_v59, 0.0 }
 0x2c1   :  { %v330_v61 = vsel %vm1220_vm12, %v329_v58, %v325_v60 }
 0x2c3   :  { %v339_v62 = vpop.xlane.xlu1 %338  ;;  %v334_v63 = vpop.xlane.xlu0 %333 }
 0x2c4   :  { %v335_v0 = vsel %vm1211_vm9, %v334_v63, %v330_v61 }
 0x2c5   :  { %v340_v2 = vsel %vm1216_vm11, %v339_v62, %v335_v0 }
 0x2c6   :  { %1034 = vrcp.f32 %v340_v2 }
 0x2c7   :  { %v345_v5 = vpop.permute.xlu0 %344 }
 0x2d3   :  { %v1035_v3 = vpop.eup %1034 }
 0x2d4   :  { %v342_v4 = vmul.f32 %v1035_v3, %v1033_v44 }
 0x2d6   :  { %v347_v6 = vmul.f32 %v345_v5, %v342_v4 }
 0x2d8   :  { %v348_v7 = vadd.f32 %v347_v6, %v1172_v10  ;;  %v523_v10 = vpop.f32.mrf.mxu0 }
 0x2d9   :  { %996 = vmatmul.mubr.msk.f32.vlgmr.msra.gmra.mxu0 %vm214_vm2, %v523_v10 }
 0x2da   :  { %v349_v8 = vsel %vm63_vm1, %v348_v7, 0.0  ;;  %v990_v20 = vpop.f32.mrf.mxu0  ;;  %1006 = vmatprep.mubr.msk.f32.mxu0 %vm1069_vm0, %v1068_v1  ;;  %999 = vmatpush3.msra.mxu0 %v680_v24 }
 0x2db   :  { %350 = vadd.xlane.f32.xlu1 %v349_v8  ;;  %1000 = vmatprep.subr.mxu0 %v1068_v1 }
 0x2dc   :  { %1001 = vmatpush3.msra.mxu0 %v679_v31 }
 0x2dd   :  { %1002 = vmatprep.subr.mxu0 %v1068_v1 }
 0x364   :  { %v351_v9 = vpop.xlane.xlu1 %350 }
 0x365   :  { %v353_v11 = vmul.f32 0.03125, %v351_v9 }
 0x367   :  { %v354_v12 = vsub.f32 %v348_v7, %v353_v11 }
 0x369   :  { %v355_v13 = vmul.f32 %v354_v12, %v354_v12 }
 0x36b   :  { %v356_v14 = vsel %vm63_vm1, %v355_v13, 0.0 }
 0x36c   :  { %357 = vadd.xlane.f32.xlu1 %v356_v14 }
 0x399   :  { %v596_v17 = vpop.f32.mrf.mxu0 }
 0x39b   :  { %v997_v38 = vpop.f32.mrf.mxu0 }
 0x3f5   :  { %v358_v23 = vpop.xlane.xlu1 %357 }
 0x3f6   :  { %v359_v26 = vmul.f32 0.03125, %v358_v23 }
 0x3f8   :  { %v360_v27 = vadd.f32 1e-05, %v359_v26 }
 0x3fa   :  { %1036 = vrsqrt.f32 %v360_v27 }
 0x407   :  { %v1037_v33 = vpop.eup %1036 }
 0x408   :  { %v362_v34 = vmul.f32 %v1037_v33, %v354_v12  ;;  %v677_v33 = vld [vmem:[%s1444_s8] sm:$0xff] }
 0x40a   :  { %v367_v36 = vmul.f32 %v366_v32, %v362_v34  ;;  %v678_v32 = vld [vmem:[%s1444_s8 + $0x8] sm:$0xff]  ;;  %v766_v34 = vld [vmem:[%s1445_s9 + $0x38] sm:$0xff] }
 0x40b   :  { %1003 = vmatpush3.msra.mxu0 %v678_v32 }
 0x40c   :  { %v372_v37 = vadd.f32 %v371_v35, %v367_v36  ;;  %1004 = vmatprep.subr.mxu0 %v1068_v1  ;;  %v765_v35 = vld [vmem:[%s1445_s9 + $0x30] sm:$0xff]  ;;  %v764_v36 = vld [vmem:[%s1445_s9 + $0x28] sm:$0xff] }
 0x40d   :  { %1005 = vmatpush3.msra.mxu0 %v677_v33 }
 0x40e   :  { %978 = vmatmul.mubr.msk.f32.vlgmr.msra.gmra.mxu1 %vm63_vm1, %v372_v37 }
 0x40f   :  { %1025 = vmatprep.mubr.msk.f32.mxu1 %vm1069_vm0, %v1068_v1  ;;  %1010 = vmatpush3.msra.mxu1 %v766_v34 }
 0x410   :  { %1011 = vmatprep.subr.mxu1 %v1068_v1 }
 0x411   :  { %1012 = vmatpush3.msra.mxu1 %v765_v35 }
 0x412   :  { %1013 = vmatprep.subr.mxu1 %v1068_v1 }
 0x413   :  { %1014 = vmatpush3.msra.mxu1 %v764_v36 }
 0x414   :  { %1015 = vmatprep.subr.mxu1 %v1068_v1 }
 0x4ce   :  { %v446_v39 = vpop.f32.mrf.mxu1 }
 0x4cf   :  { %v600_v40 = vmul.f32 %v596_v17, %v446_v39 }
 0x4d0   :  { %v979_v41 = vpop.f32.mrf.mxu1 }
 0x4d1   :  { %v601_v42 = vmul.f32 0.35355338, %v600_v40  ;;  %v669_v41 = vsub.s32 4, %v1314_v28 }
 0x4d3   :  { %v602_v43 = vmul.f32 0.17677669, %v601_v42  ;;  %v674_v42 = vsub.s32 5, %v1314_v28 }
 0x4d5   :  { %v603_v44 = vsel %vm48_vm10, %v602_v43, -3.4028235e+38  ;;  %v608_v46 = vsel %vm1220_vm12, %v602_v43, -3.4028235e+38  ;;  %v613_v48 = vsel %vm1211_vm9, %v602_v43, -3.4028235e+38 }
 0x4d6   :  { %v604_v45 = vsel %vm63_vm1, %v603_v44, -inf  ;;  %v609_v47 = vsel %vm63_vm1, %v608_v46, -inf  ;;  %v614_v49 = vsel %vm63_vm1, %v613_v48, -inf  ;;  %v618_v50 = vsel %vm1216_vm11, %v602_v43, -3.4028235e+38 }
 0x4d7   :  { %605 = vmax.xlane.f32.xlu1 %v604_v45  ;;  %v619_v51 = vsel %vm63_vm1, %v618_v50, -inf  ;;  %v675_v46 = vrot.slane %v1320_v30, %v674_v42  ;;  %v760_v50 = vld [vmem:[%s1445_s9 + $0x8] sm:$0xff] }
 0x4db   :  { %610 = vmax.xlane.f32.xlu1 %v609_v47 }
 0x4df   :  { %615 = vmax.xlane.f32.xlu1 %v614_v49  ;;  %v761_v49 = vld [vmem:[%s1445_s9 + $0x10] sm:$0xff] }
 0x4e3   :  { %620 = vmax.xlane.f32.xlu1 %v619_v51  ;;  %v759_v51 = vld [vmem:[%s1445_s9] sm:$0xff] }
 0x560   :  { %v606_v52 = vpop.xlane.xlu1 %605 }
 0x561   :  { %v607_v55 = vsel %vm48_vm10, %v606_v52, 0.0  ;;  %v683_v52 = vsub.s32 0, %v1314_v28 }
 0x564   :  { %v611_v53 = vpop.xlane.xlu1 %610 }
 0x565   :  { %v612_v56 = vsel %vm1220_vm12, %v611_v53, %v607_v55  ;;  %v684_v53 = vrot.slane %v1320_v30, %v683_v52 }
 0x568   :  { %v616_v54 = vpop.xlane.xlu1 %615 }
 0x569   :  { %v617_v57 = vsel %vm1211_vm9, %v616_v54, %v612_v56 }
 0x56c   :  { %v621_v58 = vpop.xlane.xlu1 %620 }
 0x56d   :  { %v622_v59 = vsel %vm1216_vm11, %v621_v58, %v617_v57  ;;  %v769_v58 = vsub.s32 1, %v1314_v28 }
 0x56e   :  { %v623_v60 = vsub.f32 %v602_v43, %v622_v59  ;;  %v670_v43 = vrot.slane %v1320_v30, %v669_v41 }
 0x56f   :  { %v770_v59 = vrot.slane %v1320_v30, %v769_v58 }
 0x570   :  { %v624_v61 = vmul.f32 1.442695, %v623_v60 }
 0x572   :  { %1038 = vpow2.f32 %v624_v61 }
 0x57f   :  { %v1039_v62 = vpop.eup %1038 }
 0x580   :  { %v631_v63 = vsel %vm1220_vm12, %v1039_v62, 0.0  ;;  %v626_v0 = vsel %vm48_vm10, %v1039_v62, 0.0  ;;  %v636_v4 = vsel %vm1211_vm9, %v1039_v62, 0.0  ;;  %v641_v6 = vsel %vm1216_vm11, %v1039_v62, 0.0 }
 0x581   :  { %v632_v2 = vsel %vm63_vm1, %v631_v63, 0.0  ;;  %v627_v3 = vsel %vm63_vm1, %v626_v0, 0.0  ;;  %v637_v5 = vsel %vm63_vm1, %v636_v4, 0.0  ;;  %v642_v7 = vsel %vm63_vm1, %v641_v6, 0.0 }
 0x582   :  { %633 = vadd.xlane.f32.xlu1 %v632_v2  ;;  %628 = vadd.xlane.f32.xlu0 %v627_v3 }
 0x586   :  { %638 = vadd.xlane.f32.xlu1 %v637_v5 }
 0x58a   :  { %643 = vadd.xlane.f32.xlu1 %v642_v7 }
 0x59b   :  { %649 = vrot.lane.b32.xlu1 %v596_v17, %s1070_s1  ;;  %v762_v17 = vld [vmem:[%s1445_s9 + $0x18] sm:$0xff] }
 0x60b   :  { %v634_v8 = vpop.xlane.xlu1 %633  ;;  %v629_v9 = vpop.xlane.xlu0 %628 }
 0x60c   :  { %v630_v11 = vsel %vm48_vm10, %v629_v9, 0.0  ;;  %v861_v9 = vsub.s32 6, %v1314_v28 }
 0x60d   :  { %v635_v13 = vsel %vm1220_vm12, %v634_v8, %v630_v11  ;;  %v866_v11 = vsub.s32 7, %v1314_v28 }
 0x60f   :  { %v639_v12 = vpop.xlane.xlu1 %638 }
 0x610   :  { %v640_v14 = vsel %vm1211_vm9, %v639_v12, %v635_v13  ;;  %v862_v12 = vrot.slane %v1320_v30, %v861_v9 }
 0x613   :  { %v644_v15 = vpop.xlane.xlu1 %643 }
 0x614   :  { %v645_v16 = vsel %vm1216_vm11, %v644_v15, %v640_v14  ;;  %v867_v15 = vrot.slane %v1320_v30, %v866_v11 }
 0x615   :  { %1040 = vrcp.f32 %v645_v16 }
 0x617   :  { %v650_v20 = vpop.permute.xlu1 %649 }
 0x622   :  { %v1041_v10 = vpop.eup %1040 }
 0x623   :  { %v647_v19 = vmul.f32 %v1041_v10, %v1039_v62 }
 0x625   :  { %v652_v21 = vmul.f32 %v650_v20, %v647_v19 }
 0x627   :  { %v653_v23 = vadd.f32 %v652_v21, %v372_v37  ;;  %v763_v37 = vld [vmem:[%s1445_s9 + $0x20] sm:$0xff]  ;;  %s1071_s9 = smov [#allocation2]  }
 0x628   :  { %1016 = vmatpush3.msra.mxu1 %v763_v37  ;;  %s884_s12 = sshll.u32 %s1071_s9, 4  ;;  %s885_s12 = int_to_ptr.vmem [resolvable:$true] %s884_s12 }
 0x629   :  { %v654_v18 = vsel %vm63_vm1, %v653_v23, 0.0  ;;  %1017 = vmatprep.subr.mxu1 %v1068_v1  ;;  %s1046_s13 = scalar_lea.vmem %s885_s12, 16  ;;  %s1050_s14 = scalar_lea.vmem %s885_s12, 32 }
 0x62a   :  { %655 = vadd.xlane.f32.xlu0 %v654_v18  ;;  %1018 = vmatpush3.msra.mxu1 %v762_v17  ;;  %p1047_p0 = scmp.ne.s32.totalorder %s885_s12, %s1046_s13  ;;  %p1051_p1 = scmp.lt.s32.totalorder %s885_s12, %s885_s12 }
 0x62b   :  { %1019 = vmatprep.subr.mxu1 %v1068_v1  ;;  %p1052_p2 = scmp.lt.s32.totalorder %s1050_s14, %s1046_s13 }
 0x62c   :  { %1020 = vmatpush3.msra.mxu1 %v761_v49 }
 0x62d   :  { %1021 = vmatprep.subr.mxu1 %v1068_v1  ;;  %p1053_p3 = por %p1052_p2, %p1051_p1 }
 0x62e   :  { %1022 = vmatpush3.msra.mxu1 %v760_v50 }
 0x62f   :  { %1023 = vmatprep.subr.mxu1 %v1068_v1  ;;  %p1054_p4 = pnand %p1053_p3, %p1047_p0 }
 0x630   :  { %1024 = vmatpush3.msra.mxu1 %v759_v51 }
 0x6b3   :  { %v656_v26 = vpop.xlane.xlu0 %655 }
 0x6b4   :  { %v657_v27 = vmul.f32 0.03125, %v656_v26 }
 0x6b6   :  { %v658_v25 = vsub.f32 %v653_v23, %v657_v27 }
 0x6b8   :  { %v659_v29 = vmul.f32 %v658_v25, %v658_v25 }
 0x6ba   :  { %v660_v22 = vsel %vm63_vm1, %v659_v29, 0.0 }
 0x6bb   :  { %661 = vadd.xlane.f32.xlu1 %v660_v22 }
 0x744   :  { %v662_v38 = vpop.xlane.xlu1 %661 }
 0x745   :  { %v663_v39 = vmul.f32 0.03125, %v662_v38 }
 0x747   :  { %v664_v40 = vadd.f32 1e-05, %v663_v39 }
 0x749   :  { %1042 = vrsqrt.f32 %v664_v40 }
 0x756   :  { %v1043_v44 = vpop.eup %1042 }
 0x757   :  { %v666_v45 = vmul.f32 %v1043_v44, %v658_v25 }
 0x759   :  { %v671_v47 = vmul.f32 %v670_v43, %v666_v45 }
 0x75b   :  { %v676_v48 = vadd.f32 %v675_v46, %v671_v47 }
 0x75d   :  { %1007 = vmatmul.mubr.msk.f32.vlgmr.msra.gmra.mxu0 %vm63_vm1, %v676_v48 }
 0x81d   :  { %v754_v54 = vpop.f32.mrf.mxu0 }
 0x81e   :  { %v755_v55 = vadd.f32 %v754_v54, %v684_v53 }
 0x81f   :  { %v1008_v56 = vpop.f32.mrf.mxu0 }
 0x820   :  { %v758_v57 = vmax.f32 %v755_v55, 0.0 }
 0x822   :  { %1026 = vmatmul.mubr.msk.f32.vlgmr.msra.gmra.mxu1 %vm771_vm13, %v758_v57 }
 0x8e2   :  { %v841_v60 = vpop.f32.mrf.mxu1 }
 0x8e3   :  { %v842_v61 = vadd.f32 %v841_v60, %v770_v59 }
 0x8e4   :  { %v1027_v62 = vpop.f32.mrf.mxu1 }
 0x8e5   :  { %v845_v63 = vadd.f32 %v842_v61, %v676_v48 }
 0x8e7   :  { %v846_v1 = vsel %vm63_vm1, %v845_v63, 0.0 }
 0x8e8   :  { %847 = vadd.xlane.f32.xlu0 %v846_v1 }
 0x971   :  { %v848_v0 = vpop.xlane.xlu0 %847 }
 0x972   :  { %v849_v2 = vmul.f32 0.03125, %v848_v0 }
 0x974   :  { %v850_v3 = vsub.f32 %v845_v63, %v849_v2 }
 0x976   :  { %v851_v4 = vmul.f32 %v850_v3, %v850_v3 }
 0x978   :  { %v852_v5 = vsel %vm63_vm1, %v851_v4, 0.0 }
 0x979   :  { %853 = vadd.xlane.f32.xlu0 %v852_v5 }
 0xa02   :  { %v854_v6 = vpop.xlane.xlu0 %853 }
 0xa03   :  { %v855_v7 = vmul.f32 0.03125, %v854_v6 }
 0xa05   :  { %v856_v8 = vadd.f32 1e-05, %v855_v7 }
 0xa07   :  { %1044 = vrsqrt.f32 %v856_v8 }
 0xa14   :  { %v1045_v13 = vpop.eup %1044 }
 0xa15   :  { %v858_v14 = vmul.f32 %v1045_v13, %v850_v3 }
 0xa17   :  { %v863_v16 = vmul.f32 %v862_v12, %v858_v14 }
 0xa19   :  { %v868_v10 = vadd.f32 %v867_v15, %v863_v16 }
 0xa1b   :  { %v869_v19 = vsel %vm63_vm1, %v868_v10, 0.0 }
 0xa1c   :  { %v870_v20 = vrot.slane %v869_v19, 4 }
 0xa1e   :  { %v871_v21 = vadd.f32 %v870_v20, %v869_v19 }
 0xa20   :  { %v872_v23 = vrot.slane %v871_v21, 2 }
 0xa22   :  { %v873_v18 = vadd.f32 %v872_v23, %v871_v21 }
 0xa24   :  { %v874_v26 = vrot.slane %v873_v18, 1 }
 0xa26   :  { %v875_v27 = vadd.f32 %v874_v26, %v873_v18 }
 0xa28   :  { %877 = vst.msk [vmem:[#allocation2] sm:$0x1] %vm876_vm14, %v875_v27 }
 0xa29   :  { %1057 = shalt.err (!%p1054_p4)
}
 0xa2a   :  { %887 = dma.vmem_to_hbm [thread:$0]  %s885_s12, 16, %s1447_s11, [#allocation3]  }
 0xa2b   :  { %1066 = dma.done.wait [#allocation3], 16  }
 0xa2c   :  { %1067 = vsyncadd [#allocation3], 4294967280 }
 0xa2d   :  { %891 = vsyncpa [#allocation3], 1 }

</bundles_post_ra>
